<compile_context>
chip_gen: v6e
topology: v6e:2x2x1
jax: 0.10.0
libtpu: 0.0.40
codegen_flags: <defaults>
</compile_context>

<pallas_src>
import jax
import jax.numpy as jnp
from jax import lax
from jax.experimental import pallas as pl
from jax.experimental.pallas import tpu as pltpu

LANES = 128
_UNROLL_C = 64  # statically unroll the channel loop up to this many channels


def _vmem_capacity_bytes():
    """Physical VMEM per core; fall back to the smallest current part (v7x)."""
    try:
        cap = getattr(pltpu.get_tpu_info(), "vmem_capacity_bytes", None)
        if cap:
            return int(cap)
    except Exception:
        pass
    return 64 << 20


def _sublane_tile(dtype):
    # rows per native tile: 8 for 4-byte, 16 for 2-byte, 32 for 1-byte dtypes
    return max(8, 32 // jnp.dtype(dtype).itemsize)


def _sigmoid_from_logit(z):
    # exp and the approximate reciprocal both ride the (otherwise idle) EUP
    # slot; no VPU divide.
    return pl.reciprocal(1.0 + jnp.exp(-z), approx=True)


def _weighted_channel_sum(get_chan, w_ref, num_channels, acc_shape):
    """acc = sum_c w[c] * get_chan(c), accumulated in f32 (plain VPU madds)."""
    if num_channels <= _UNROLL_C:
        acc = get_chan(0).astype(jnp.float32) * w_ref[0]
        for c in range(1, num_channels):
            acc = acc + get_chan(c).astype(jnp.float32) * w_ref[c]
        return acc

    def body(c, acc):
        return acc + get_chan(c).astype(jnp.float32) * w_ref[c]

    return lax.fori_loop(0, num_channels, body, jnp.zeros(acc_shape, jnp.float32))


def _channel_gate_kernel_lanes(x_ref, w_ref, b_ref, o_ref):
    """Sublane-dense path. x_ref/o_ref: (1, C, TS, 128); w_ref SMEM (C,); b_ref SMEM (1,)."""
    C = x_ref.shape[1]
    acc = _weighted_channel_sum(lambda c: x_ref[0, c], w_ref, C, x_ref.shape[2:])
    gate = _sigmoid_from_logit(acc + b_ref[0]).astype(o_ref.dtype)  # (TS, 128)

    if C <= _UNROLL_C:
        for c in range(C):
            o_ref[0, c] = x_ref[0, c] * gate
    else:
        def body(c, carry):
            o_ref[0, c] = x_ref[0, c] * gate
            return carry

        lax.fori_loop(0, C, body, 0)


def _channel_gate_kernel_generic(x_ref, w_ref, b_ref, o_ref):
    """Ragged-S fallback. x_ref/o_ref: (1, C, T); w_ref SMEM (C,); b_ref SMEM (1,)."""
    C, T = x_ref.shape[1], x_ref.shape[2]
    acc = _weighted_channel_sum(
        lambda c: x_ref[0, pl.ds(c, 1), :], w_ref, C, (1, T))
    gate = _sigmoid_from_logit(acc + b_ref[0]).astype(o_ref.dtype)  # (1, T)
    o_ref[0] = x_ref[0] * gate  # broadcast over channels


def channel_gate(x, w, b):
    """x: (N, C, *spatial); w: Conv3d(C->1, k=1) weight (any shape with C elems); b: scalar."""
    N, C = x.shape[0], x.shape[1]
    S = 1
    for d in x.shape[2:]:
        S *= d

    w1 = jnp.asarray(w, jnp.float32).reshape(C)
    b1 = jnp.asarray(b, jnp.float32).reshape(1)

    elem = jnp.dtype(x.dtype).itemsize
    vmem_cap = _vmem_capacity_bytes()
    # Auto-pipeline footprint = 2 double-buffered copies each of the input and
    # output block, plus f32 acc/gate temporaries.  Budget against the real
    # (padding-aware) block bytes and tell the compiler explicitly.
    budget = min(vmem_cap // 2, 48 << 20)
    block_target = max(1 << 20, min(8 << 20, budget // 5))

    if S % LANES == 0:
        # Sublane-dense layout: last two block dims are spatial, so a small C
        # never pads a vreg sublane tile.
        s_sub = S // LANES
        x_in = x.reshape(N, C, s_sub, LANES)          # free, contiguous reshape
        ts = max(1, block_target // (C * LANES * elem))
        if s_sub <= 8:
            ts = s_sub                                 # full (small) dim is legal
        else:
            ts = min(s_sub, max(8, (ts // 8) * 8))     # (8,128)-aligned tile
        grid = (N, pl.cdiv(s_sub, ts))
        block = (1, C, ts, LANES)
        index_map = lambda n, s: (n, 0, s, 0)
        kernel = _channel_gate_kernel_lanes
        block_bytes = C * ts * LANES * elem            # ts is 8-aligned / full dim
        gate_bytes = ts * LANES * 4
        out_shape = jax.ShapeDtypeStruct((N, C, s_sub, LANES), x.dtype)
    else:
        # Ragged spatial extent: (N, C, S) layout, 128-multiple spatial tile,
        # cdiv grid + masked writeback for the last partial tile (never one
        # giant whole-S block).
        x_in = x.reshape(N, C, S)
        sub = _sublane_tile(x.dtype)
        c_pad = ((C + sub - 1) // sub) * sub           # sublane-padded channels
        if S < LANES:
            tile_s = S                                 # full (small) dim is legal
        else:
            tile_s = max(LANES, (block_target // (c_pad * elem)) // LANES * LANES)
            tile_s = min(tile_s, (S // LANES) * LANES)
        grid = (N, pl.cdiv(S, tile_s))
        block = (1, C, tile_s)
        index_map = lambda n, s: (n, 0, s)
        kernel = _channel_gate_kernel_generic
        block_bytes = c_pad * tile_s * elem
        gate_bytes = tile_s * 4
        out_shape = jax.ShapeDtypeStruct((N, C, S), x.dtype)

    # 2x(in) + 2x(out) double-buffered blocks + f32 acc/gate temps + margin.
    vmem_limit = 4 * block_bytes + 4 * gate_bytes + (8 << 20)
    vmem_limit = max(16 << 20, min(vmem_limit, vmem_cap - (8 << 20)))

    out = pl.pallas_call(
        kernel,
        out_shape=out_shape,
        grid_spec=pltpu.PrefetchScalarGridSpec(
            num_scalar_prefetch=0,
            grid=grid,
            in_specs=[
                pl.BlockSpec(block, index_map),
                pl.BlockSpec(memory_space=pltpu.MemorySpace.SMEM),  # w: (C,)
                pl.BlockSpec(memory_space=pltpu.MemorySpace.SMEM),  # b: (1,)
            ],
            out_specs=pl.BlockSpec(block, index_map),
        ),
        compiler_params=pltpu.CompilerParams(
            # Both grid axes independent -> megacore/TC sharding where available.
            dimension_semantics=("parallel", "parallel"),
            vmem_limit_bytes=int(vmem_limit),
        ),
    )(x_in, w1, b1)

    return out.reshape(x.shape)


def _channel_gate_ref(x, w, b):
    xf = x.astype(jnp.float32)
    z = jnp.einsum("nc...,c->n...", xf, jnp.asarray(w, jnp.float32)) + jnp.float32(b)
    g = jax.nn.sigmoid(z)[:, None, ...]
    return (xf * g).astype(x.dtype)


if __name__ == "__main__":
    key = jax.random.PRNGKey(0)
    k1, k2, k3 = jax.random.split(key, 3)

    # Small net3d-style 5D activation: (N, C, D, H, W); S = 2048 (lane-aligned path)
    N, C, D, H, W = 2, 4, 8, 16, 16
    x = jax.random.normal(k1, (N, C, D, H, W), dtype=jnp.float32)
    w = jax.random.normal(k2, (C,), dtype=jnp.float32) * 0.5  # Conv3d(C->1, k=1) weight
    b = jax.random.normal(k3, (), dtype=jnp.float32) * 0.1    # Conv3d bias

    y = jax.block_until_ready(channel_gate(x, w, b))
    y_ref = _channel_gate_ref(x, w, b)
    assert y.shape == x.shape and y.dtype == x.dtype
    # Tolerance accounts for the EUP approximate-reciprocal in the sigmoid.
    assert jnp.allclose(y, y_ref, atol=3e-3, rtol=3e-3)

    # Also exercise the ragged-spatial fallback path (S = 390, not a 128 multiple).
    x2 = jax.random.normal(k1, (1, 4, 3, 10, 13), dtype=jnp.float32)
    y2 = jax.block_until_ready(channel_gate(x2, w, b))
    y2_ref = _channel_gate_ref(x2, w, b)
    assert y2.shape == x2.shape and y2.dtype == x2.dtype
    assert jnp.allclose(y2, y2_ref, atol=3e-3, rtol=3e-3)

    print("KERNEL_OK")
</pallas_src>

<mosaic_0001>
module attributes {stable_mosaic.version = 11 : i64} {
  func.func @_channel_gate_kernel_lanes(%arg0: i32, %arg1: i32, %arg2: memref<1x4x16x128xf32, #tpu.memory_space<vmem>>, %arg3: memref<4xf32, #tpu.memory_space<smem>>, %arg4: memref<1xf32, #tpu.memory_space<smem>>, %arg5: memref<1x4x16x128xf32, #tpu.memory_space<vmem>>) attributes {dimension_semantics = [#tpu.dimension_semantics<parallel>, #tpu.dimension_semantics<parallel>], iteration_bounds = array<i64: 2, 1>, scalar_prefetch = 0 : i64, scratch_operands = 0 : i64, tpu.core_type = #tpu.core_type<tc>, window_params = [{transform_indices = @transform_0, window_bounds = array<i64: 1, 4, 16, 128>}, {transform_indices = @transform_1, window_bounds = array<i64: 4>}, {transform_indices = @transform_2, window_bounds = array<i64: 1>}, {transform_indices = @transform_3, window_bounds = array<i64: 1, 4, 16, 128>}]} {
    %c0 = arith.constant 0 : index
    %c0_0 = arith.constant 0 : index
    %c0_1 = arith.constant 0 : index
    %c0_2 = arith.constant 0 : index
    %0 = vector.load %arg2[%c0, %c0_0, %c0_1, %c0_2] : memref<1x4x16x128xf32, #tpu.memory_space<vmem>>, vector<1x1x16x128xf32>
    %1 = vector.shape_cast %0 : vector<1x1x16x128xf32> to vector<16x128xf32>
    %c0_3 = arith.constant 0 : index
    %2 = memref.load %arg3[%c0_3] : memref<4xf32, #tpu.memory_space<smem>>
    %3 = vector.broadcast %2 : f32 to vector<16x128xf32>
    %4 = arith.mulf %1, %3 : vector<16x128xf32>
    %c0_4 = arith.constant 0 : index
    %c1 = arith.constant 1 : index
    %c0_5 = arith.constant 0 : index
    %c0_6 = arith.constant 0 : index
    %5 = vector.load %arg2[%c0_4, %c1, %c0_5, %c0_6] : memref<1x4x16x128xf32, #tpu.memory_space<vmem>>, vector<1x1x16x128xf32>
    %6 = vector.shape_cast %5 : vector<1x1x16x128xf32> to vector<16x128xf32>
    %c1_7 = arith.constant 1 : index
    %7 = memref.load %arg3[%c1_7] : memref<4xf32, #tpu.memory_space<smem>>
    %8 = vector.broadcast %7 : f32 to vector<16x128xf32>
    %9 = arith.mulf %6, %8 : vector<16x128xf32>
    %10 = arith.addf %4, %9 : vector<16x128xf32>
    %c0_8 = arith.constant 0 : index
    %c2 = arith.constant 2 : index
    %c0_9 = arith.constant 0 : index
    %c0_10 = arith.constant 0 : index
    %11 = vector.load %arg2[%c0_8, %c2, %c0_9, %c0_10] : memref<1x4x16x128xf32, #tpu.memory_space<vmem>>, vector<1x1x16x128xf32>
    %12 = vector.shape_cast %11 : vector<1x1x16x128xf32> to vector<16x128xf32>
    %c2_11 = arith.constant 2 : index
    %13 = memref.load %arg3[%c2_11] : memref<4xf32, #tpu.memory_space<smem>>
    %14 = vector.broadcast %13 : f32 to vector<16x128xf32>
    %15 = arith.mulf %12, %14 : vector<16x128xf32>
    %16 = arith.addf %10, %15 : vector<16x128xf32>
    %c0_12 = arith.constant 0 : index
    %c3 = arith.constant 3 : index
    %c0_13 = arith.constant 0 : index
    %c0_14 = arith.constant 0 : index
    %17 = vector.load %arg2[%c0_12, %c3, %c0_13, %c0_14] : memref<1x4x16x128xf32, #tpu.memory_space<vmem>>, vector<1x1x16x128xf32>
    %18 = vector.shape_cast %17 : vector<1x1x16x128xf32> to vector<16x128xf32>
    %c3_15 = arith.constant 3 : index
    %19 = memref.load %arg3[%c3_15] : memref<4xf32, #tpu.memory_space<smem>>
    %20 = vector.broadcast %19 : f32 to vector<16x128xf32>
    %21 = arith.mulf %18, %20 : vector<16x128xf32>
    %22 = arith.addf %16, %21 : vector<16x128xf32>
    %c0_16 = arith.constant 0 : index
    %23 = memref.load %arg4[%c0_16] : memref<1xf32, #tpu.memory_space<smem>>
    %24 = vector.broadcast %23 : f32 to vector<16x128xf32>
    %25 = arith.addf %22, %24 : vector<16x128xf32>
    %cst = arith.constant 0.000000e+00 : f32
    %26 = vector.broadcast %cst : f32 to vector<16x128xf32>
    %27 = arith.subf %26, %25 : vector<16x128xf32>
    %28 = math.exp %27 : vector<16x128xf32>
    %cst_17 = arith.constant 1.000000e+00 : f32
    %29 = vector.broadcast %cst_17 : f32 to vector<16x128xf32>
    %30 = arith.addf %29, %28 : vector<16x128xf32>
    %31 = tpu.reciprocal %30 {approx = true} : vector<16x128xf32> -> vector<16x128xf32>
    %c0_18 = arith.constant 0 : index
    %c0_19 = arith.constant 0 : index
    %c0_20 = arith.constant 0 : index
    %c0_21 = arith.constant 0 : index
    %32 = vector.load %arg2[%c0_18, %c0_19, %c0_20, %c0_21] : memref<1x4x16x128xf32, #tpu.memory_space<vmem>>, vector<1x1x16x128xf32>
    %33 = vector.shape_cast %32 : vector<1x1x16x128xf32> to vector<16x128xf32>
    %34 = arith.mulf %33, %31 : vector<16x128xf32>
    %c0_22 = arith.constant 0 : index
    %c0_23 = arith.constant 0 : index
    %c0_24 = arith.constant 0 : index
    %c0_25 = arith.constant 0 : index
    %35 = vector.load %arg5[%c0_22, %c0_23, %c0_24, %c0_25] : memref<1x4x16x128xf32, #tpu.memory_space<vmem>>, vector<1x1x16x128xf32>
    %36 = vector.shape_cast %35 : vector<1x1x16x128xf32> to vector<16x128xf32>
    %37 = vector.shape_cast %34 : vector<16x128xf32> to vector<1x1x16x128xf32>
    tpu.vector_store %arg5[%c0_22, %c0_23, %c0_24, %c0_25], %37 {strides = array<i32>} : memref<1x4x16x128xf32, #tpu.memory_space<vmem>>, vector<1x1x16x128xf32>,
    %c0_26 = arith.constant 0 : index
    %c1_27 = arith.constant 1 : index
    %c0_28 = arith.constant 0 : index
    %c0_29 = arith.constant 0 : index
    %38 = vector.load %arg2[%c0_26, %c1_27, %c0_28, %c0_29] : memref<1x4x16x128xf32, #tpu.memory_space<vmem>>, vector<1x1x16x128xf32>
    %39 = vector.shape_cast %38 : vector<1x1x16x128xf32> to vector<16x128xf32>
    %40 = arith.mulf %39, %31 : vector<16x128xf32>
    %c0_30 = arith.constant 0 : index
    %c1_31 = arith.constant 1 : index
    %c0_32 = arith.constant 0 : index
    %c0_33 = arith.constant 0 : index
    %41 = vector.load %arg5[%c0_30, %c1_31, %c0_32, %c0_33] : memref<1x4x16x128xf32, #tpu.memory_space<vmem>>, vector<1x1x16x128xf32>
    %42 = vector.shape_cast %41 : vector<1x1x16x128xf32> to vector<16x128xf32>
    %43 = vector.shape_cast %40 : vector<16x128xf32> to vector<1x1x16x128xf32>
    tpu.vector_store %arg5[%c0_30, %c1_31, %c0_32, %c0_33], %43 {strides = array<i32>} : memref<1x4x16x128xf32, #tpu.memory_space<vmem>>, vector<1x1x16x128xf32>,
    %c0_34 = arith.constant 0 : index
    %c2_35 = arith.constant 2 : index
    %c0_36 = arith.constant 0 : index
    %c0_37 = arith.constant 0 : index
    %44 = vector.load %arg2[%c0_34, %c2_35, %c0_36, %c0_37] : memref<1x4x16x128xf32, #tpu.memory_space<vmem>>, vector<1x1x16x128xf32>
    %45 = vector.shape_cast %44 : vector<1x1x16x128xf32> to vector<16x128xf32>
    %46 = arith.mulf %45, %31 : vector<16x128xf32>
    %c0_38 = arith.constant 0 : index
    %c2_39 = arith.constant 2 : index
    %c0_40 = arith.constant 0 : index
    %c0_41 = arith.constant 0 : index
    %47 = vector.load %arg5[%c0_38, %c2_39, %c0_40, %c0_41] : memref<1x4x16x128xf32, #tpu.memory_space<vmem>>, vector<1x1x16x128xf32>
    %48 = vector.shape_cast %47 : vector<1x1x16x128xf32> to vector<16x128xf32>
    %49 = vector.shape_cast %46 : vector<16x128xf32> to vector<1x1x16x128xf32>
    tpu.vector_store %arg5[%c0_38, %c2_39, %c0_40, %c0_41], %49 {strides = array<i32>} : memref<1x4x16x128xf32, #tpu.memory_space<vmem>>, vector<1x1x16x128xf32>,
    %c0_42 = arith.constant 0 : index
    %c3_43 = arith.constant 3 : index
    %c0_44 = arith.constant 0 : index
    %c0_45 = arith.constant 0 : index
    %50 = vector.load %arg2[%c0_42, %c3_43, %c0_44, %c0_45] : memref<1x4x16x128xf32, #tpu.memory_space<vmem>>, vector<1x1x16x128xf32>
    %51 = vector.shape_cast %50 : vector<1x1x16x128xf32> to vector<16x128xf32>
    %52 = arith.mulf %51, %31 : vector<16x128xf32>
    %c0_46 = arith.constant 0 : index
    %c3_47 = arith.constant 3 : index
    %c0_48 = arith.constant 0 : index
    %c0_49 = arith.constant 0 : index
    %53 = vector.load %arg5[%c0_46, %c3_47, %c0_48, %c0_49] : memref<1x4x16x128xf32, #tpu.memory_space<vmem>>, vector<1x1x16x128xf32>
    %54 = vector.shape_cast %53 : vector<1x1x16x128xf32> to vector<16x128xf32>
    %55 = vector.shape_cast %52 : vector<16x128xf32> to vector<1x1x16x128xf32>
    tpu.vector_store %arg5[%c0_46, %c3_47, %c0_48, %c0_49], %55 {strides = array<i32>} : memref<1x4x16x128xf32, #tpu.memory_space<vmem>>, vector<1x1x16x128xf32>,
    return
  }
  func.func @transform_0(%arg0: i32, %arg1: i32) -> (i32, i32, i32, i32) {
    %c0_i32 = arith.constant 0 : i32
    %c0_i32_0 = arith.constant 0 : i32
    %c0_i32_1 = arith.constant 0 : i32
    return %arg0, %c0_i32, %arg1, %c0_i32_0 : i32, i32, i32, i32
  }
  func.func @transform_1(%arg0: i32, %arg1: i32) -> i32 {
    %c0_i32 = arith.constant 0 : i32
    %c0_i32_0 = arith.constant 0 : i32
    return %c0_i32 : i32
  }
  func.func @transform_2(%arg0: i32, %arg1: i32) -> i32 {
    %c0_i32 = arith.constant 0 : i32
    %c0_i32_0 = arith.constant 0 : i32
    return %c0_i32 : i32
  }
  func.func @transform_3(%arg0: i32, %arg1: i32) -> (i32, i32, i32, i32) {
    %c0_i32 = arith.constant 0 : i32
    %c0_i32_0 = arith.constant 0 : i32
    %c0_i32_1 = arith.constant 0 : i32
    return %arg0, %c0_i32, %arg1, %c0_i32_0 : i32, i32, i32, i32
  }
}

</mosaic_0001>

<bundles_post_ra>
// kernel: tpu_custom_call.1
= control target key start
LH: loop header
LB: loop body
LE: loop exit
PB: predicated region body
PF: predicated region fallthrough
CT: control target
= control target key end

     0   :  { %s882_s0 = inlined_call_operand.hbm [shape: f32[2,4,16,128], index: 0, kind: input, shape index: {}]   ;;  %s883_s1 = inlined_call_operand.vmem [shape: f32[4], index: 1, kind: input, shape index: {}]   ;;  %s884_s2 = inlined_call_operand.<no memory space> [shape: f32[1], index: 2, kind: input, shape index: {}]   ;;  %s885_s3 = inlined_call_operand.hbm [shape: f32[2,4,16,128], index: 3, kind: output, shape index: {}]  }
   0x1   :  { %8 = sst [smem:[#allocation2]] %s884_s2 }
   0x2   :  { %9 = vsyncpa [#allocation4], 0 }
   0x3   :  { %11 = vsyncpa [#allocation4 + $0x1], 0 }
   0x4   :  { %12 = vsyncpa [#allocation6], 0 }
   0x5   :  { %13 = vsyncpa [#allocation5], 0 }
   0x6   :  { %15 = vsyncpa [#allocation5 + $0x1], 0  ;;  %s695_s14 = smov 0   ;;  %s697_s15 = smov 0  }
   0x7   :  { %s699_s16 = smov 0   ;;  %s701_s17 = smov 0  }
   0x8   :  { %s703_s18 = smov 0   ;;  %s705_s19 = smov 0  }
   0x9 LB: > { %s411_s2 = sadd.s32 4294967295, %s663_s19   ;;  %s412_s20 = sadd.s32 4294967294, %s663_s19   ;;  %s663_s19 = sphi %s705_s19, %s21_s19   ;;  %s659_s18 = sphi %s703_s18, %s903_s18   ;;  %s655_s17 = sphi %s701_s17, %s902_s17   ;;  %s651_s16 = sphi %s699_s16, %s901_s16   ;;  %s647_s15 = sphi %s697_s15, %s900_s15   ;;  %s643_s14 = sphi %s695_s14, %s899_s14  }
   0xa   : > { %s42_s21 = sadd.s32 1, %s651_s16  ;;  %p49_p0 = scmp.ne.s32.totalorder %s651_s16, %s647_s15 }
   0xb   : > { %p50_p1 = scmp.eq.s32.totalorder %s663_s19, 0  ;;  %p55_p2 = scmp.ne.s32.totalorder %s647_s15, %s643_s14 }
   0xc   : > { %p733_p3 = scmp.eq.s32.totalorder %s411_s2, 0  ;;  %p123_p4 = scmp.eq.s32.totalorder %s411_s2, 1 }
   0xd   : > { %p737_p5 = por %p50_p1, %p49_p0  ;;  %p129_p6 = scmp.eq.s32.totalorder %s412_s20, 1 }
   0xe   : > { %p743_p7 = por %p733_p3, %p55_p2  ;;  %p747_p8 = por %p123_p4, %p49_p0 }
   0xf   : > { %p751_p9 = por %p129_p6, %p55_p2  ;;  %p413_p10 = scmp.ge.s32.totalorder %s663_s19, 1 }
  0x10   : > { %s890_s25 = scalar_select %p747_p8, 1, 0 }
  0x11   : > { %s891_s26 = scalar_select %p751_p9, 1, 0 }
  0x12   : > { %p136_p11 = scmp.lt.s32.totalorder %s663_s19, 3  ;;  %s149_s29 = sshll.u32 %s883_s1, 4  ;;  %s150_s29 = int_to_ptr.vmem [resolvable:$true] %s149_s29 }
  0x13   : > { %p472_p0 = scmp.lt.s32.totalorder %s663_s19, 2  ;;  %s33_s6 = sadd.s32 1, %s659_s18 }
  0x14   : > { %p760_p12 = pnand %p413_p10, %p136_p11  ;;  %p781_p6 = scmp.ge.s32.totalorder %s33_s6, 2 }
  0x15   : > { %p770_p2 = pnand %p472_p0, %p737_p5  ;;  %s163_s8 = sand.u32 1, %s651_s16  }
  0x16   : > { %p459_p1 = pneg %p760_p12  ;;  %s536_s9 = scalar_lea.vmem %s150_s29, 16 }
  0x17   : > { %p537_p10 = scmp.ne.s32.totalorder %s150_s29, %s536_s9  ;;  %p544_p13 = scmp.lt.s32.totalorder %s150_s29, %s150_s29 }
  0x18   : > { %p776_p4 = pnand %p459_p1, %p733_p3  ;;  %p545_p9 = scmp.lt.s32.totalorder %s536_s9, %s536_s9 }
  0x1a   : > { %p538_p11 = pneg %p776_p4  ;;  %p546_p8 = por %p545_p9, %p544_p13 }
  0x1c   : > { %p539_p5 = pnand %p538_p11, %p537_p10 }
  0x1e   : > { %p540_p0 = pneg %p539_p5 }
  0x20   : > { %p547_p1 = pnand %p546_p8, %p540_p0 }
  0x22   : > { %550 = shalt.err (!%p547_p1)
}
  0x23   : > { %s665_s10 = smov [#allocation7]   ;;  %s905_s6 = smov (%p781_p6, %s33_s6), 0 }
  0x24   : > { %462 = dma.vmem_to_smem (!%p776_p4), %s150_s29, 16, %s665_s10, [#allocation6]  }
  0x25   : > { %s416_s11 = sshll.u32 %s163_s8, 6  ;;  %s37_s12 = ssub.s32 %s659_s18, %s905_s6 }
  0x26   : > { %p40_p10 = scmp.eq.s32.totalorder %s37_s12, 0  ;;  %s449_s13 = sshll.u32 %s659_s18, 10 }
  0x27   : > { %s175_s23 = scalar_lea.hbm %s882_s0, %s449_s13  ;;  %s167_s27 = scalar_lea.vmem [#allocation3], %s416_s11 }
  0x28   : > { %s176_s28 = sshll.u32 %s167_s27, 4  ;;  %s164_s9 = scalar_lea.sflag [#allocation4], %s163_s8  ;;  %s177_s28 = int_to_ptr.vmem [resolvable:$true] %s176_s28 }
  0x29   : > { %s803_s5 = scalar_select %p40_p10, %s651_s16, %s42_s21  }
  0x2a   : > { %p553_p8 = pneg %p770_p2  ;;  %s564_s29 = scalar_lea.vmem %s177_s28, 1024 }
  0x2b   : > { %p565_p9 = scmp.ne.s32.totalorder %s177_s28, %s564_s29  ;;  %s666_s7 = smov [#allocation3]  }
  0x2c   : > { %s569_s10 = sshll.u32 %s666_s7, 4  ;;  %s570_s10 = int_to_ptr.vmem [resolvable:$false] %s569_s10 }
  0x2d   : > { %p567_p13 = pnand %p565_p9, %p553_p8  ;;  %s571_s12 = scalar_lea.vmem %s570_s10, 2048 }
  0x2e   : > { %p572_p6 = scmp.lt.s32.totalorder %s177_s28, %s570_s10  ;;  %p573_p11 = scmp.lt.s32.totalorder %s571_s12, %s564_s29 }
  0x2f   : > { %p568_p4 = pneg %p567_p13 }
  0x30   : > { %p574_p5 = por %p573_p11, %p572_p6 }
  0x32   : > { %p575_p0 = pnand %p574_p5, %p568_p4 }
  0x34   : > { %578 = shalt.err (!%p575_p0)
}
  0x35   : > { %s667_s11 = smov 128   ;;  %s668_s21 = smov 8  }
  0x36   : > { %466 = dma.hbm_to_vmem [thread:$0]  (!%p770_p2), %s175_s23, 1024, %s177_s28, %s164_s9, %s667_s11, %s667_s11, %s668_s21  }
  0x37   : > { %188 = sbr.rel (%p760_p12) target bundleno = 136 (0x88), region = 32  ;;  %s812_s8 = sand.u32 (!%p760_p12), 1, %s647_s15  }
  0x38   : > { %s420_s13 = sshll.u32 (!%p760_p12), %s812_s8, 6  ;;  %s191_s2 = scalar_lea.sflag (!%p760_p12), [#allocation4], %s812_s8 }
  0x39   : > { %s194_s20 = scalar_lea.vmem (!%p760_p12), [#allocation3], %s420_s13 }
  0x3c   : > { %630 = dma.done.wait (%p743_p7), %s191_s2, 1024  }
  0x3d   : > { %632 = vsyncadd (%p743_p7), %s191_s2, 4294966272 }
  0x3e   : > { %634 = dma.done.wait (%p733_p3), [#allocation6], 16  }
  0x3f   : > { %636 = vsyncadd (%p733_p3), [#allocation6], 4294967280 }
  0x40   : > { %203 = sfence }
  0x41   : > { %s226_s30 = sld [smem:[#allocation7]]  ;;  %v224_v0 = vld [vmem:[%s194_s20] sm:$0xff]  ;;  %v225_v1 = vld [vmem:[%s194_s20 + $0x8] sm:$0xff]  ;;  %v423_v2 = vld [vmem:[%s194_s20 + $0x10] sm:$0xff]  ;;  %s221_s22 = scalar_lea.vmem [#allocation8], %s420_s13 }
  0x42   : > { %s425_s4 = sld [smem:[#allocation7 + $0x1]]  ;;  %v424_v3 = vld [vmem:[%s194_s20 + $0x18] sm:$0xff]  ;;  %v426_v5 = vld [vmem:[%s194_s20 + $0x20] sm:$0xff]  ;;  %v427_v6 = vld [vmem:[%s194_s20 + $0x28] sm:$0xff]  ;;  %s312_s24 = sshll.u32 %s221_s22, 4  ;;  %s829_s24 = int_to_ptr.vmem [resolvable:$true] %s312_s24 }
  0x43   : > { %s428_s23 = sld [smem:[#allocation7 + $0x2]]  ;;  %v429_v9 = vld [vmem:[%s194_s20 + $0x30] sm:$0xff]  ;;  %v430_v14 = vld [vmem:[%s194_s20 + $0x38] sm:$0xff]  ;;  %s450_s9 = sshll.u32 %s655_s17, 10 }
  0x44   : > { %s431_s27 = sld [smem:[#allocation7 + $0x3]]  ;;  %s834_s10 = scalar_lea.hbm %s885_s3, %s450_s9 }
  0x45   : > { %s257_s28 = sld [smem:[#allocation2]]  ;;  %s297_s17 = scalar_lea.sflag [#allocation5], %s812_s8 }
  0x46   : > { %s579_s12 = scalar_lea.vmem %s829_s24, 1024  ;;  %p896_p7 = scmp.ne.s32.totalorder %s890_s25, 0 }
  0x47   : > { %v227_v4 = vstv %s226_s30  ;;  %p580_p3 = scmp.ne.s32.totalorder %s829_s24, %s579_s12  ;;  %s669_s11 = smov [#allocation8]  }
  0x48   : > { %v228_v7 = vmul.f32 %v227_v4, %v224_v0  ;;  %v234_v8 = vstv %s425_s4  ;;  %v229_v10 = vmul.f32 %v227_v4, %v225_v1  ;;  %s583_s21 = sshll.u32 %s669_s11, 4  ;;  %s584_s21 = int_to_ptr.vmem [resolvable:$false] %s583_s21 }
  0x49   : > { %v235_v11 = vmul.f32 %v423_v2, %v234_v8  ;;  %v243_v12 = vstv %s428_s23  ;;  %v236_v13 = vmul.f32 %v424_v3, %v234_v8  ;;  %p581_p12 = pnand %p580_p3, %p896_p7  ;;  %s585_s13 = scalar_lea.vmem %s584_s21, 2048 }
  0x4a   : > { %v244_v15 = vmul.f32 %v426_v5, %v243_v12  ;;  %v252_v16 = vstv %s431_s27  ;;  %v245_v17 = vmul.f32 %v427_v6, %v243_v12  ;;  %p586_p1 = scmp.lt.s32.totalorder %s829_s24, %s584_s21  ;;  %p587_p10 = scmp.lt.s32.totalorder %s585_s13, %s579_s12 }
  0x4b   : > { %v237_v18 = vadd.f32 %v235_v11, %v228_v7  ;;  %v253_v19 = vmul.f32 %v429_v9, %v252_v16  ;;  %v238_v20 = vadd.f32 %v236_v13, %v229_v10  ;;  %v254_v21 = vmul.f32 %v430_v14, %v252_v16  ;;  %p582_p2 = pneg %p581_p12 }
  0x4c   : > { %v258_v24 = vstv %s257_s28  ;;  %p588_p8 = por %p587_p10, %p586_p1 }
  0x4d   : > { %v246_v22 = vadd.f32 %v244_v15, %v237_v18  ;;  %v247_v23 = vadd.f32 %v245_v17, %v238_v20 }
  0x4e   : > { %p589_p9 = pnand %p588_p8, %p582_p2 }
  0x4f   : > { %v255_v25 = vadd.f32 %v253_v19, %v246_v22  ;;  %v256_v26 = vadd.f32 %v254_v21, %v247_v23 }
  0x51   : > { %v259_v27 = vadd.f32 %v258_v24, %v255_v25  ;;  %v260_v28 = vadd.f32 %v258_v24, %v256_v26 }
  0x53   : > { %v261_v29 = vsub.f32 0.0, %v259_v27  ;;  %v262_v30 = vsub.f32 0.0, %v260_v28 }
  0x55   : > { %v263_v31 = vmul.f32 1.442695, %v261_v29  ;;  %v265_v32 = vmul.f32 1.442695, %v262_v30 }
  0x57   : > { %528 = vpow2.f32 %v263_v31 }
  0x58   : > { %530 = vpow2.f32 %v265_v32 }
  0x64   : > { %v529_v33 = vpop.eup %528 }
  0x65   : > { %v531_v34 = vpop.eup %530  ;;  %v267_v35 = vadd.f32 1.0, %v529_v33 }
  0x66   : > { %v268_v36 = vadd.f32 1.0, %v531_v34 }
  0x67   : > { %532 = vrcp.f32 %v267_v35 }
  0x68   : > { %534 = vrcp.f32 %v268_v36 }
  0x74   : > { %v533_v37 = vpop.eup %532 }
  0x75   : > { %v535_v38 = vpop.eup %534  ;;  %v271_v39 = vmul.f32 %v533_v37, %v224_v0  ;;  %v277_v40 = vmul.f32 %v533_v37, %v423_v2  ;;  %v284_v41 = vmul.f32 %v533_v37, %v426_v5  ;;  %v291_v42 = vmul.f32 %v533_v37, %v429_v9 }
  0x76   : > { %v272_v43 = vmul.f32 %v535_v38, %v225_v1  ;;  %v278_v44 = vmul.f32 %v535_v38, %v424_v3  ;;  %v285_v45 = vmul.f32 %v535_v38, %v427_v6  ;;  %v292_v46 = vmul.f32 %v535_v38, %v430_v14 }
  0x77   : > { %273 = vst [vmem:[%s221_s22] sm:$0xff] %v271_v39  ;;  %434 = vst [vmem:[%s221_s22 + $0x10] sm:$0xff] %v277_v40 }
  0x78   : > { %438 = vst [vmem:[%s221_s22 + $0x20] sm:$0xff] %v284_v41  ;;  %442 = vst [vmem:[%s221_s22 + $0x30] sm:$0xff] %v291_v42 }
  0x79   : > { %274 = vst [vmem:[%s221_s22 + $0x8] sm:$0xff] %v272_v43  ;;  %435 = vst [vmem:[%s221_s22 + $0x18] sm:$0xff] %v278_v44 }
  0x7a   : > { %439 = vst [vmem:[%s221_s22 + $0x28] sm:$0xff] %v285_v45  ;;  %443 = vst [vmem:[%s221_s22 + $0x38] sm:$0xff] %v292_v46 }
  0x7b   : > { %592 = shalt.err (!%p589_p9)
}
  0x7c   : > { %s593_s2 = scalar_lea.hbm %s834_s10, 1024  ;;  %s597_s4 = scalar_lea.hbm %s885_s3, 2048 }
  0x7d   : > { %p594_p13 = scmp.ne.s32.totalorder %s834_s10, %s593_s2  ;;  %p598_p11 = scmp.lt.s32.totalorder %s834_s10, %s885_s3 }
  0x7e   : > { %p599_p5 = scmp.lt.s32.totalorder %s597_s4, %s593_s2 }
  0x7f   : > { %p595_p4 = pnand %p594_p13, %p896_p7 }
  0x80   : > { %p600_p0 = por %p599_p5, %p598_p11 }
  0x81   : > { %p596_p6 = pneg %p595_p4 }
  0x83   : > { %p601_p3 = pnand %p600_p0, %p596_p6 }
  0x85   : > { %604 = shalt.err (!%p601_p3)
}
  0x86   : > { %s670_s28 = smov 128   ;;  %s671_s22 = smov 8  }
  0x87   : > { %457 = dma.vmem_to_hbm [thread:$0]  (%p896_p7), %s829_s24, 1024, %s834_s10, %s297_s17, %s670_s28, %s670_s28, %s671_s22  }
  0x88 PF: > { %s327_s9 = sand.u32 1, %s643_s14   ;;  %p897_p12 = scmp.ne.s32.totalorder %s891_s26, 0 }
  0x89   : > { %p898_p2 = scmp.ge.s32.totalorder %s663_s19, 2  ;;  %s328_s29 = scalar_lea.sflag [#allocation5], %s327_s9 }
  0x8b   : > { %p468_p1 = pnand %p898_p2, %p897_p12 }
  0x8d   : > { %p469_p10 = pneg %p468_p1 }
  0x8f   : > { %638 = dma.done.wait (%p469_p10), %s328_s29, 1024  }
  0x90   : > { %640 = vsyncadd (%p469_p10), %s328_s29, 4294966272  ;;  %s21_s19 = sadd.s32 1, %s663_s19   ;;  %s899_s14 = smov %s647_s15 }
  0x91   : > { %p18_p8 = scmp.ge.s32.totalorder %s21_s19, 4   ;;  %s900_s15 = smov %s651_s16 }
  0x92   : > { %s901_s16 = smov %s803_s5  ;;  %s902_s17 = smov %s659_s18 }
  0x93   : > { %s903_s18 = smov %s905_s6  ;;  %20 = sbr.rel (!%p18_p8) target bundleno = 9 (0x9), region = 88 }
  0x98   :  { %333 = vsyncpa [#allocation4], 1 }
  0x99   :  { %335 = vsyncpa [#allocation4 + $0x1], 1 }
  0x9a   :  { %336 = vsyncpa [#allocation5], 1 }
  0x9b   :  { %338 = vsyncpa [#allocation5 + $0x1], 1 }
  0x9c   :  { %339 = vsyncpa [#allocation6], 1 }
  0x9d   :  { %341 = vsyncpa [#allocation6 + $0x1], 1 }

</bundles_post_ra>
